<compile_context>
chip_gen: v7x
topology: tpu7x:2x2x1
jax: 0.10.0
libtpu: 0.0.40
codegen_flags: <defaults>
</compile_context>

<pallas_src>
import functools

import jax
import jax.numpy as jnp
from jax.experimental import pallas as pl
from jax.experimental.pallas import tpu as pltpu


def lr_kernel(a1_ref, conn_ref, a2_ref, w1_ref, w2_ref, w3_ref, b_ref, o_ref):
    # o = a1 @ W1 + conn @ W2 + a2 @ W3 + b   (all f32, MXU accumulation)
    o = jnp.dot(a1_ref[...], w1_ref[...], preferred_element_type=jnp.float32)
    o = o + jnp.dot(conn_ref[...], w2_ref[...],
                    preferred_element_type=jnp.float32)
    o = o + jnp.dot(a2_ref[...], w3_ref[...],
                    preferred_element_type=jnp.float32)
    o_ref[...] = o + b_ref[...]            # (1, L_pad) broadcasts over batch


@functools.partial(jax.jit, static_argnames=("block_b",))
def lr_forward(arg1, conn, arg2, weight, bias, *, block_b=512):
    """Forward pass of LR: cat([arg1, conn, arg2], dim=1) @ W.T + b."""
    # Match PyTorch's .float() on the inputs.
    arg1 = arg1.astype(jnp.float32)
    conn = conn.astype(jnp.float32)
    arg2 = arg2.astype(jnp.float32)

    B, N = arg1.shape
    L = weight.shape[0]

    # --- Parameter prep (done once outside the kernel) -----------------------
    # Pre-transpose: (L, 3N) -> (3N, L); pad label axis to a full 128-lane slab
    # so the kernel's output stores are lane-dense (zero rows/cols are exact).
    wt = weight.astype(jnp.float32).T                      # (3N, L)
    L_pad = max(128, ((L + 127) // 128) * 128)
    if L_pad != L:
        wt = jnp.pad(wt, ((0, 0), (0, L_pad - L)))
        b_pad = jnp.pad(bias.astype(jnp.float32), (0, L_pad - L))
    else:
        b_pad = bias.astype(jnp.float32)
    w1, w2, w3 = wt[:N], wt[N:2 * N], wt[2 * N:]           # each (N, L_pad)
    b2d = b_pad.reshape(1, L_pad)

    # --- Batch tiling ---------------------------------------------------------
    tb = min(block_b, B)                                   # rows per grid step
    num_tiles = pl.cdiv(B, tb)
    B_pad = num_tiles * tb
    if B_pad != B:
        pad = ((0, B_pad - B), (0, 0))
        arg1 = jnp.pad(arg1, pad)
        conn = jnp.pad(conn, pad)
        arg2 = jnp.pad(arg2, pad)

    x_spec = pl.BlockSpec((tb, N), lambda i: (i, 0))
    w_spec = pl.BlockSpec((N, L_pad), lambda i: (0, 0))    # resident in VMEM
    b_spec = pl.BlockSpec((1, L_pad), lambda i: (0, 0))    # resident in VMEM

    out = pl.pallas_call(
        lr_kernel,
        out_shape=jax.ShapeDtypeStruct((B_pad, L_pad), jnp.float32),
        grid=(num_tiles,),
        in_specs=[x_spec, x_spec, x_spec, w_spec, w_spec, w_spec, b_spec],
        out_specs=pl.BlockSpec((tb, L_pad), lambda i: (i, 0)),
        compiler_params=pltpu.CompilerParams(
            dimension_semantics=("parallel",)),
    )(arg1, conn, arg2, w1, w2, w3, b2d)

    return out[:B, :L]


if __name__ == "__main__":
    # Module config: labels has 4 entries, num_length = 32 -> in_features = 96.
    labels = ["a", "b", "c", "d"]
    num_length = 32
    num_labels = len(labels)
    batch = 8

    key = jax.random.PRNGKey(0)
    k_w, k1, k2, k3 = jax.random.split(key, 4)

    # Deterministic parameter init mirroring reset_parameters():
    #   weight ~ Normal(0, 0.01), bias = 0.
    weight = 0.01 * jax.random.normal(
        k_w, (num_labels, num_length * 3), dtype=jnp.float32)
    bias = jnp.zeros((num_labels,), dtype=jnp.float32)

    # Example inputs (arg1, conn, arg2), each (batch, num_length).
    arg1 = jax.random.normal(k1, (batch, num_length), dtype=jnp.float32)
    conn = jax.random.normal(k2, (batch, num_length), dtype=jnp.float32)
    arg2 = jax.random.normal(k3, (batch, num_length), dtype=jnp.float32)

    out = lr_forward(arg1, conn, arg2, weight, bias)
    jax.block_until_ready(out)

    # Pure-JAX reference check.
    x_ref = jnp.concatenate([arg1, conn, arg2], axis=1)
    ref = x_ref @ weight.T + bias
    assert out.shape == (batch, num_labels)
    assert jnp.allclose(out, ref, atol=1e-5), "mismatch vs reference"

    print("KERNEL_OK")
</pallas_src>

<mosaic_0001>
module attributes {stable_mosaic.version = 11 : i64} {
  func.func @lr_kernel(%arg0: i32, %arg1: memref<8x32xf32, #tpu.memory_space<vmem>>, %arg2: memref<8x32xf32, #tpu.memory_space<vmem>>, %arg3: memref<8x32xf32, #tpu.memory_space<vmem>>, %arg4: memref<32x128xf32, #tpu.memory_space<vmem>>, %arg5: memref<32x128xf32, #tpu.memory_space<vmem>>, %arg6: memref<32x128xf32, #tpu.memory_space<vmem>>, %arg7: memref<1x128xf32, #tpu.memory_space<vmem>>, %arg8: memref<8x128xf32, #tpu.memory_space<vmem>>) attributes {dimension_semantics = [#tpu.dimension_semantics<parallel>], iteration_bounds = array<i64: 1>, scalar_prefetch = 0 : i64, scratch_operands = 0 : i64, tpu.core_type = #tpu.core_type<tc>, window_params = [{transform_indices = @transform_0, window_bounds = array<i64: 8, 32>}, {transform_indices = @transform_1, window_bounds = array<i64: 8, 32>}, {transform_indices = @transform_2, window_bounds = array<i64: 8, 32>}, {pipeline_mode = #tpu.pipeline_mode<synchronous>, transform_indices = @transform_3, window_bounds = array<i64: 32, 128>}, {pipeline_mode = #tpu.pipeline_mode<synchronous>, transform_indices = @transform_4, window_bounds = array<i64: 32, 128>}, {pipeline_mode = #tpu.pipeline_mode<synchronous>, transform_indices = @transform_5, window_bounds = array<i64: 32, 128>}, {pipeline_mode = #tpu.pipeline_mode<synchronous>, transform_indices = @transform_6, window_bounds = array<i64: 1, 128>}, {transform_indices = @transform_7, window_bounds = array<i64: 8, 128>}]} {
    %c0 = arith.constant 0 : index
    %c0_0 = arith.constant 0 : index
    %0 = vector.load %arg1[%c0, %c0_0] : memref<8x32xf32, #tpu.memory_space<vmem>>, vector<8x32xf32>
    %c0_1 = arith.constant 0 : index
    %c0_2 = arith.constant 0 : index
    %1 = vector.load %arg4[%c0_1, %c0_2] : memref<32x128xf32, #tpu.memory_space<vmem>>, vector<32x128xf32>
    %cst = arith.constant dense<0.000000e+00> : vector<8x128xf32>
    %2 = tpu.matmul %0, %1, %cst {dimension_numbers = #tpu.dot_dimension_numbers<[1], [0], [0], [1], [0, 0, 1, 1], [], []>} : vector<8x32xf32>, vector<32x128xf32>, vector<8x128xf32> -> vector<8x128xf32>
    %c0_3 = arith.constant 0 : index
    %c0_4 = arith.constant 0 : index
    %3 = vector.load %arg2[%c0_3, %c0_4] : memref<8x32xf32, #tpu.memory_space<vmem>>, vector<8x32xf32>
    %c0_5 = arith.constant 0 : index
    %c0_6 = arith.constant 0 : index
    %4 = vector.load %arg5[%c0_5, %c0_6] : memref<32x128xf32, #tpu.memory_space<vmem>>, vector<32x128xf32>
    %cst_7 = arith.constant dense<0.000000e+00> : vector<8x128xf32>
    %5 = tpu.matmul %3, %4, %cst_7 {dimension_numbers = #tpu.dot_dimension_numbers<[1], [0], [0], [1], [0, 0, 1, 1], [], []>} : vector<8x32xf32>, vector<32x128xf32>, vector<8x128xf32> -> vector<8x128xf32>
    %6 = arith.addf %2, %5 : vector<8x128xf32>
    %c0_8 = arith.constant 0 : index
    %c0_9 = arith.constant 0 : index
    %7 = vector.load %arg3[%c0_8, %c0_9] : memref<8x32xf32, #tpu.memory_space<vmem>>, vector<8x32xf32>
    %c0_10 = arith.constant 0 : index
    %c0_11 = arith.constant 0 : index
    %8 = vector.load %arg6[%c0_10, %c0_11] : memref<32x128xf32, #tpu.memory_space<vmem>>, vector<32x128xf32>
    %cst_12 = arith.constant dense<0.000000e+00> : vector<8x128xf32>
    %9 = tpu.matmul %7, %8, %cst_12 {dimension_numbers = #tpu.dot_dimension_numbers<[1], [0], [0], [1], [0, 0, 1, 1], [], []>} : vector<8x32xf32>, vector<32x128xf32>, vector<8x128xf32> -> vector<8x128xf32>
    %10 = arith.addf %6, %9 : vector<8x128xf32>
    %c0_13 = arith.constant 0 : index
    %c0_14 = arith.constant 0 : index
    %11 = vector.load %arg7[%c0_13, %c0_14] : memref<1x128xf32, #tpu.memory_space<vmem>>, vector<1x128xf32>
    %12 = vector.broadcast %11 : vector<1x128xf32> to vector<8x128xf32>
    %13 = arith.addf %10, %12 : vector<8x128xf32>
    %c0_15 = arith.constant 0 : index
    %c0_16 = arith.constant 0 : index
    %14 = vector.load %arg8[%c0_15, %c0_16] : memref<8x128xf32, #tpu.memory_space<vmem>>, vector<8x128xf32>
    tpu.vector_store %arg8[%c0_15, %c0_16], %13 {strides = array<i32>} : memref<8x128xf32, #tpu.memory_space<vmem>>, vector<8x128xf32>,
    return
  }
  func.func @transform_0(%arg0: i32) -> (i32, i32) {
    %c0_i32 = arith.constant 0 : i32
    %c0_i32_0 = arith.constant 0 : i32
    return %arg0, %c0_i32 : i32, i32
  }
  func.func @transform_1(%arg0: i32) -> (i32, i32) {
    %c0_i32 = arith.constant 0 : i32
    %c0_i32_0 = arith.constant 0 : i32
    return %arg0, %c0_i32 : i32, i32
  }
  func.func @transform_2(%arg0: i32) -> (i32, i32) {
    %c0_i32 = arith.constant 0 : i32
    %c0_i32_0 = arith.constant 0 : i32
    return %arg0, %c0_i32 : i32, i32
  }
  func.func @transform_3(%arg0: i32) -> (i32, i32) {
    %c0_i32 = arith.constant 0 : i32
    %c0_i32_0 = arith.constant 0 : i32
    %c0_i32_1 = arith.constant 0 : i32
    return %c0_i32, %c0_i32_0 : i32, i32
  }
  func.func @transform_4(%arg0: i32) -> (i32, i32) {
    %c0_i32 = arith.constant 0 : i32
    %c0_i32_0 = arith.constant 0 : i32
    %c0_i32_1 = arith.constant 0 : i32
    return %c0_i32, %c0_i32_0 : i32, i32
  }
  func.func @transform_5(%arg0: i32) -> (i32, i32) {
    %c0_i32 = arith.constant 0 : i32
    %c0_i32_0 = arith.constant 0 : i32
    %c0_i32_1 = arith.constant 0 : i32
    return %c0_i32, %c0_i32_0 : i32, i32
  }
  func.func @transform_6(%arg0: i32) -> (i32, i32) {
    %c0_i32 = arith.constant 0 : i32
    %c0_i32_0 = arith.constant 0 : i32
    %c0_i32_1 = arith.constant 0 : i32
    return %c0_i32, %c0_i32_0 : i32, i32
  }
  func.func @transform_7(%arg0: i32) -> (i32, i32) {
    %c0_i32 = arith.constant 0 : i32
    %c0_i32_0 = arith.constant 0 : i32
    return %arg0, %c0_i32 : i32, i32
  }
}

</mosaic_0001>

<bundles_post_ra>
// kernel: lr_forward.1
= control target key start
LH: loop header
LB: loop body
LE: loop exit
PB: predicated region body
PF: predicated region fallthrough
CT: control target
= control target key end

     0   :  { %v348_v0 = vmov 0.0|0.0   ;;  %vm349_vm0 = vmmov 0   ;;  %v350_v8 = vmov 0.0   ;;  %vm36_vm1 = vcmask 261120   ;;  %s448_s4 = inlined_call_operand.vmem [shape: f32[32,128], index: 4, kind: input, shape index: {}]   ;;  %s449_s3 = inlined_call_operand.vmem [shape: f32[32,128], index: 3, kind: input, shape index: {}]   ;;  %s450_s5 = inlined_call_operand.vmem [shape: f32[32,128], index: 5, kind: input, shape index: {}]   ;;  %s451_s1 = inlined_call_operand.vmem [shape: f32[8,32], index: 1, kind: input, shape index: {}]   ;;  %s452_s0 = inlined_call_operand.vmem [shape: f32[8,32], index: 0, kind: input, shape index: {}]   ;;  %s453_s2 = inlined_call_operand.vmem [shape: f32[8,32], index: 2, kind: input, shape index: {}]   ;;  %s454_s6 = inlined_call_operand.vmem [shape: f32[1,128], index: 6, kind: input, shape index: {}]   ;;  %s455_s7 = inlined_call_operand.vmem [shape: f32[8,128], index: 7, kind: output, shape index: {}]  }
   0x1   :  { %327 = vmatprep.subr.bf16.mxu0 %v348_v0  ;;  %v32_v1 = vld [vmem:[%s448_s4] sm:$0xff]  ;;  %v33_v2 = vld [vmem:[%s448_s4 + $0x8] sm:$0xff]  ;;  %333 = vmatprep.subr.bf16.mxu1 %v348_v0  ;;  %v34_v6 = vld [vmem:[%s448_s4 + $0x10] sm:$0xff] }
   0x2   :  { %v27_v3 = vld [vmem:[%s449_s3] sm:$0xff]  ;;  %v328_v4 = vpack.c.bf16 %v33_v2, %v32_v1  ;;  %v28_v5 = vld [vmem:[%s449_s3 + $0x8] sm:$0xff]  ;;  %v35_v7 = vld [vmem:[%s448_s4 + $0x18] sm:$0xff]  ;;  %302 = vmatprep.mubr.msk.f32.mxu0 %vm349_vm0, %v350_v8  ;;  %313 = vmatprep.mubr.msk.f32.mxu1 %vm349_vm0, %v350_v8 }
   0x3   :  { %v334_v9 = vpack.c.bf16 %v28_v5, %v27_v3  ;;  %v29_v10 = vld [vmem:[%s449_s3 + $0x10] sm:$0xff]  ;;  %v30_v11 = vld [vmem:[%s449_s3 + $0x18] sm:$0xff]  ;;  %v331_v12 = vpack.c.bf16 %v35_v7, %v34_v6  ;;  %v184_v14 = vld [vmem:[%s450_s5] sm:$0xff] }
   0x4   :  { %329 = vmatpush3.bf16.msra.mxu0 %v328_v4  ;;  %v337_v13 = vpack.c.bf16 %v30_v11, %v29_v10  ;;  %v185_v15 = vld [vmem:[%s450_s5 + $0x8] sm:$0xff]  ;;  %v31_v16 = vld [vmem:[%s451_s1] sm:$0xff]  ;;  %v186_v19 = vld [vmem:[%s450_s5 + $0x10] sm:$0xff] }
   0x5   :  { %335 = vmatpush3.bf16.msra.mxu1 %v334_v9  ;;  %330 = vmatprep.subr.bf16.mxu0 %v348_v0  ;;  %v340_v17 = vpack.c.bf16 %v185_v15, %v184_v14  ;;  %v26_v18 = vld [vmem:[%s452_s0] sm:$0xff]  ;;  %v187_v20 = vld [vmem:[%s450_s5 + $0x18] sm:$0xff] }
   0x6   :  { %336 = vmatprep.subr.bf16.mxu1 %v348_v0  ;;  %v343_v21 = vpack.c.bf16 %v187_v20, %v186_v19  ;;  %v183_v22 = vld [vmem:[%s453_s2] sm:$0xff] }
   0x7   :  { %v278_v29 = vld [vmem:[%s454_s6] ss:$0 sm:$0xff] }
   0x8   :  { %332 = vmatpush3.bf16.msra.mxu0 %v331_v12 }
   0x9   :  { %338 = vmatpush3.bf16.msra.mxu1 %v337_v13  ;;  %339 = vmatprep.subr.bf16.mxu0 %v348_v0 }
   0xb   :  { %303 = vmatmul.mubr.msk.f32.vlgmr.msra.gmra.mrb[0].mxu0 %vm36_vm1, %v31_v16 }
   0xc   :  { %314 = vmatmul.mubr.msk.f32.vlgmr.msra.gmra.mrb[0].mxu1 %vm36_vm1, %v26_v18  ;;  %341 = vmatpush3.bf16.msra.mxu0 %v340_v17 }
   0xd   :  { %342 = vmatprep.subr.bf16.mxu0 %v348_v0  ;;  %324 = vmatprep.mubr.msk.f32.mxu0 %vm349_vm0, %v350_v8 }
  0x10   :  { %344 = vmatpush3.bf16.msra.mxu0 %v343_v21 }
  0x13   :  { %325 = vmatmul.mubr.msk.f32.vlgmr.msra.gmra.mrb[2].mxu0 %vm36_vm1, %v183_v22 }
  0xde   :  { %v106_v23 = vpop.f32.mrb[0].mxu0 }
  0xdf   :  { %v304_v24 = vpop.f32.mrb[1].mxu0  ;;  %v179_v25 = vpop.f32.mrb[0].mxu1 }
  0xe0   :  { %v180_v26 = vadd.f32 %v179_v25, %v106_v23  ;;  %v315_v27 = vpop.f32.mrb[1].mxu1 }
  0xe6   :  { %v257_v28 = vpop.f32.mrb[2].mxu0 }
  0xe7   :  { %v261_v30 = vadd.f32 %v257_v28, %v180_v26  ;;  %v326_v31 = vpop.f32.mrb[3].mxu0 }
  0xe9   :  { %v269_v32 = vadd.f32 %v278_v29, %v261_v30 }
  0xeb   :  { %270 = vst [vmem:[%s455_s7] sm:$0xff] %v269_v32 }

</bundles_post_ra>
